<compile_context>
chip_gen: v5e
topology: v5e:2x2
jax: 0.10.0
libtpu: 0.0.40
codegen_flags: <defaults>
</compile_context>

<pallas_src>
import jax
import jax.numpy as jnp
from jax.experimental import pallas as pl
from jax.experimental.pallas import tpu as pltpu


def mlp_kernel(x_ref, w2_ref, b2_ref, w3_ref, b3_ref, o_ref):
    # x_ref:  (24, TB)   batch on the lane axis
    # w2_ref: (6, 24), b2_ref: (6, 1)
    # w3_ref: (3, 6),  b3_ref: (3, 1)
    # o_ref:  (3, TB)
    x = x_ref[...]
    # fc2 + tanh : (6,24) @ (24,TB) + (6,1) -> (6,TB)
    h = jnp.tanh(
        jnp.dot(w2_ref[...], x, preferred_element_type=jnp.float32) + b2_ref[...]
    )
    # fc3 : (3,6) @ (6,TB) + (3,1) -> (3,TB)
    logits = (
        jnp.dot(w3_ref[...], h, preferred_element_type=jnp.float32) + b3_ref[...]
    )
    # log_softmax over the feature axis (axis 0 here == dim=1 of the PyTorch module)
    m = jnp.max(logits, axis=0, keepdims=True)              # (1, TB)
    shifted = logits - m
    lse = jnp.log(jnp.sum(jnp.exp(shifted), axis=0, keepdims=True))
    o_ref[...] = (shifted - lse).astype(o_ref.dtype)


def nn_forward(x, w2, b2, w3, b3, *, tb=2048):
    """x: (B, 24) float32; w2: (6,24); b2: (6,); w3: (3,6); b3: (3,).
    Returns (B, 3) log-probabilities, matching the PyTorch module."""
    B = x.shape[0]
    # Lane-dense tile size: multiple of 128, capped at `tb`, bounded by B.
    b_round = max(128, pl.cdiv(B, 128) * 128)
    TB = min(tb, b_round)
    B_pad = pl.cdiv(B, TB) * TB

    # Transpose to (features, batch) and zero-pad the batch (lane) axis.
    xt = jnp.pad(x, ((0, B_pad - B), (0, 0))).T          # (24, B_pad)
    b2c = b2.reshape(6, 1)
    b3c = b3.reshape(3, 1)

    out_t = pl.pallas_call(
        mlp_kernel,
        out_shape=jax.ShapeDtypeStruct((3, B_pad), jnp.float32),
        grid=(B_pad // TB,),
        in_specs=[
            pl.BlockSpec((24, TB), lambda i: (0, i)),   # x tile, pipelined over batch
            pl.BlockSpec((6, 24), lambda i: (0, 0)),    # weights/bias stay resident
            pl.BlockSpec((6, 1), lambda i: (0, 0)),
            pl.BlockSpec((3, 6), lambda i: (0, 0)),
            pl.BlockSpec((3, 1), lambda i: (0, 0)),
        ],
        out_specs=pl.BlockSpec((3, TB), lambda i: (0, i)),
        compiler_params=pltpu.CompilerParams(
            dimension_semantics=("parallel",)),
    )(xt, w2, b2c, w3, b3c)

    return out_t.T[:B, :]                                 # (B, 3)


def init_params(key):
    # PyTorch nn.Linear layout: weight (out, in), bias (out,),
    # init uniform(-1/sqrt(fan_in), 1/sqrt(fan_in)).
    k1, k2, k3, k4 = jax.random.split(key, 4)
    bound2 = 1.0 / jnp.sqrt(24.0)
    bound3 = 1.0 / jnp.sqrt(6.0)
    w2 = jax.random.uniform(k1, (6, 24), jnp.float32, -bound2, bound2)
    b2 = jax.random.uniform(k2, (6,), jnp.float32, -bound2, bound2)
    w3 = jax.random.uniform(k3, (3, 6), jnp.float32, -bound3, bound3)
    b3 = jax.random.uniform(k4, (3,), jnp.float32, -bound3, bound3)
    return w2, b2, w3, b3


if __name__ == "__main__":
    key = jax.random.PRNGKey(0)
    kx, kp = jax.random.split(key)
    B = 8
    x = jax.random.normal(kx, (B, 24), jnp.float32)
    w2, b2, w3, b3 = init_params(kp)

    out = nn_forward(x, w2, b2, w3, b3)
    jax.block_until_ready(out)

    # Reference in plain JAX (PyTorch convention: y = x @ W.T + b)
    h_ref = jnp.tanh(x @ w2.T + b2)
    logits_ref = h_ref @ w3.T + b3
    ref = jax.nn.log_softmax(logits_ref, axis=1)
    assert out.shape == (B, 3)
    assert jnp.allclose(out, ref, atol=1e-5), "mismatch vs reference"
    print("KERNEL_OK")
</pallas_src>

<mosaic_0001>
module attributes {stable_mosaic.version = 11 : i64} {
  func.func @mlp_kernel(%arg0: i32, %arg1: memref<24x128xf32, #tpu.memory_space<vmem>>, %arg2: memref<6x24xf32, #tpu.memory_space<vmem>>, %arg3: memref<6x1xf32, #tpu.memory_space<vmem>>, %arg4: memref<3x6xf32, #tpu.memory_space<vmem>>, %arg5: memref<3x1xf32, #tpu.memory_space<vmem>>, %arg6: memref<3x128xf32, #tpu.memory_space<vmem>>) attributes {dimension_semantics = [#tpu.dimension_semantics<parallel>], iteration_bounds = array<i64: 1>, scalar_prefetch = 0 : i64, scratch_operands = 0 : i64, tpu.core_type = #tpu.core_type<tc>, window_params = [{transform_indices = @transform_0, window_bounds = array<i64: 24, 128>}, {pipeline_mode = #tpu.pipeline_mode<synchronous>, transform_indices = @transform_1, window_bounds = array<i64: 6, 24>}, {pipeline_mode = #tpu.pipeline_mode<synchronous>, transform_indices = @transform_2, window_bounds = array<i64: 6, 1>}, {pipeline_mode = #tpu.pipeline_mode<synchronous>, transform_indices = @transform_3, window_bounds = array<i64: 3, 6>}, {pipeline_mode = #tpu.pipeline_mode<synchronous>, transform_indices = @transform_4, window_bounds = array<i64: 3, 1>}, {transform_indices = @transform_5, window_bounds = array<i64: 3, 128>}]} {
    %c0 = arith.constant 0 : index
    %c0_0 = arith.constant 0 : index
    %0 = vector.load %arg1[%c0, %c0_0] : memref<24x128xf32, #tpu.memory_space<vmem>>, vector<24x128xf32>
    %c0_1 = arith.constant 0 : index
    %c0_2 = arith.constant 0 : index
    %1 = vector.load %arg2[%c0_1, %c0_2] : memref<6x24xf32, #tpu.memory_space<vmem>>, vector<6x24xf32>
    %cst = arith.constant dense<0.000000e+00> : vector<6x128xf32>
    %2 = tpu.matmul %1, %0, %cst {dimension_numbers = #tpu.dot_dimension_numbers<[1], [0], [0], [1], [0, 0, 1, 1], [], []>} : vector<6x24xf32>, vector<24x128xf32>, vector<6x128xf32> -> vector<6x128xf32>
    %c0_3 = arith.constant 0 : index
    %c0_4 = arith.constant 0 : index
    %3 = vector.load %arg3[%c0_3, %c0_4] : memref<6x1xf32, #tpu.memory_space<vmem>>, vector<6x1xf32>
    %4 = vector.broadcast %3 : vector<6x1xf32> to vector<6x128xf32>
    %5 = arith.addf %2, %4 : vector<6x128xf32>
    %6 = math.tanh %5 : vector<6x128xf32>
    %c0_5 = arith.constant 0 : index
    %c0_6 = arith.constant 0 : index
    %7 = vector.load %arg4[%c0_5, %c0_6] : memref<3x6xf32, #tpu.memory_space<vmem>>, vector<3x6xf32>
    %cst_7 = arith.constant dense<0.000000e+00> : vector<3x128xf32>
    %8 = tpu.matmul %7, %6, %cst_7 {dimension_numbers = #tpu.dot_dimension_numbers<[1], [0], [0], [1], [0, 0, 1, 1], [], []>} : vector<3x6xf32>, vector<6x128xf32>, vector<3x128xf32> -> vector<3x128xf32>
    %c0_8 = arith.constant 0 : index
    %c0_9 = arith.constant 0 : index
    %9 = vector.load %arg5[%c0_8, %c0_9] : memref<3x1xf32, #tpu.memory_space<vmem>>, vector<3x1xf32>
    %10 = vector.broadcast %9 : vector<3x1xf32> to vector<3x128xf32>
    %11 = arith.addf %8, %10 : vector<3x128xf32>
    %cst_10 = arith.constant dense<0xFF800000> : vector<128xf32>
    %12 = vector.multi_reduction <maximumf>, %11, %cst_10 [0] : vector<3x128xf32> to vector<128xf32>
    %13 = vector.shape_cast %12 : vector<128xf32> to vector<1x128xf32>
    %14 = vector.broadcast %13 : vector<1x128xf32> to vector<3x128xf32>
    %15 = arith.subf %11, %14 : vector<3x128xf32>
    %16 = math.exp %15 : vector<3x128xf32>
    %cst_11 = arith.constant dense<0.000000e+00> : vector<128xf32>
    %17 = vector.multi_reduction <add>, %16, %cst_11 [0] : vector<3x128xf32> to vector<128xf32>
    %18 = vector.shape_cast %17 : vector<128xf32> to vector<1x128xf32>
    %19 = math.log %18 : vector<1x128xf32>
    %20 = vector.broadcast %19 : vector<1x128xf32> to vector<3x128xf32>
    %21 = arith.subf %15, %20 : vector<3x128xf32>
    %c0_12 = arith.constant 0 : index
    %c0_13 = arith.constant 0 : index
    %22 = vector.load %arg6[%c0_12, %c0_13] : memref<3x128xf32, #tpu.memory_space<vmem>>, vector<3x128xf32>
    tpu.vector_store %arg6[%c0_12, %c0_13], %21 {strides = array<i32>} : memref<3x128xf32, #tpu.memory_space<vmem>>, vector<3x128xf32>,
    return
  }
  func.func @transform_0(%arg0: i32) -> (i32, i32) {
    %c0_i32 = arith.constant 0 : i32
    %c0_i32_0 = arith.constant 0 : i32
    return %c0_i32, %arg0 : i32, i32
  }
  func.func @transform_1(%arg0: i32) -> (i32, i32) {
    %c0_i32 = arith.constant 0 : i32
    %c0_i32_0 = arith.constant 0 : i32
    %c0_i32_1 = arith.constant 0 : i32
    return %c0_i32, %c0_i32_0 : i32, i32
  }
  func.func @transform_2(%arg0: i32) -> (i32, i32) {
    %c0_i32 = arith.constant 0 : i32
    %c0_i32_0 = arith.constant 0 : i32
    %c0_i32_1 = arith.constant 0 : i32
    return %c0_i32, %c0_i32_0 : i32, i32
  }
  func.func @transform_3(%arg0: i32) -> (i32, i32) {
    %c0_i32 = arith.constant 0 : i32
    %c0_i32_0 = arith.constant 0 : i32
    %c0_i32_1 = arith.constant 0 : i32
    return %c0_i32, %c0_i32_0 : i32, i32
  }
  func.func @transform_4(%arg0: i32) -> (i32, i32) {
    %c0_i32 = arith.constant 0 : i32
    %c0_i32_0 = arith.constant 0 : i32
    %c0_i32_1 = arith.constant 0 : i32
    return %c0_i32, %c0_i32_0 : i32, i32
  }
  func.func @transform_5(%arg0: i32) -> (i32, i32) {
    %c0_i32 = arith.constant 0 : i32
    %c0_i32_0 = arith.constant 0 : i32
    return %c0_i32, %arg0 : i32, i32
  }
}

</mosaic_0001>

<bundles_post_ra>
// kernel: tpu_custom_call.1
= control target key start
LH: loop header
LB: loop body
LE: loop exit
PB: predicated region body
PF: predicated region fallthrough
CT: control target
= control target key end

     0   :  { %10 = vsyncpa [#allocation3], 0  ;;  %s266_s0 = inlined_call_operand.hbm [shape: f32[24,128], index: 0, kind: input, shape index: {}]   ;;  %s267_s1 = inlined_call_operand.vmem [shape: f32[6,24], index: 1, kind: input, shape index: {}]   ;;  %s268_s2 = inlined_call_operand.vmem [shape: f32[6,1], index: 2, kind: input, shape index: {}]   ;;  %s269_s3 = inlined_call_operand.vmem [shape: f32[3,6], index: 3, kind: input, shape index: {}]   ;;  %s270_s4 = inlined_call_operand.vmem [shape: f32[3,1], index: 4, kind: input, shape index: {}]   ;;  %s271_s5 = inlined_call_operand.hbm [shape: f32[3,128], index: 5, kind: output, shape index: {}]  }
   0x1   :  { %11 = vsyncpa [#allocation4], 0  ;;  %s16_s20 = sshll.u32 %s266_s0, 4  ;;  %s213_s21 = smov [#allocation2]   ;;  %s17_s20 = int_to_ptr.hbm [resolvable:$true] %s16_s20 }
   0x2   :  { %s18_s22 = sshll.u32 %s213_s21, 4  ;;  %s214_s23 = smov 128   ;;  %s19_s22 = int_to_ptr.vmem [resolvable:$true] %s18_s22 }
   0x3   :  { %s215_s24 = smov 8  }
   0x4   :  { %24 = dma.hbm_to_vmem [thread:$0]  %s17_s20, 384, %s19_s22, [#allocation3], %s214_s23, %s214_s23, %s215_s24  }
   0x5   :  { %209 = dma.done.wait [#allocation3], 384  }
   0x6   :  { %210 = vsyncadd [#allocation3], 4294966912  ;;  %v216_v0 = vmov 0   ;;  %v39_v1 = vld [vmem:[#allocation2 + $0x10] sm:$0xff]  ;;  %v38_v2 = vld [vmem:[#allocation2 + $0x8] sm:$0xff]  ;;  %vm47_vm0 = vcmask 195584  }
   0x7   :  { %154 = vset.pattern.permute.xlu0 %v216_v0  ;;  %64 = vmatpush.msra.mxu0 %v39_v1  ;;  %v41_v3 = vld [vmem:[%s268_s2] sm:$0x3f]  ;;  %vm83_vm1 = vcmask 1045504   ;;  %vm79_vm2 = vcmask 48128   ;;  %vm107_vm3 = vcmask 1042432   ;;  %s136_s7 = sshll.u32 %s271_s5, 4  ;;  %s137_s7 = int_to_ptr.hbm [resolvable:$true] %s136_s7 }
   0x8   :  { %v37_v4 = vld [vmem:[#allocation2] sm:$0xff]  ;;  %44 = vperm.xlu0 %154, %v41_v3  }
   0x9   :  { %65 = vmatpush.msra.mxu0 %v38_v2  ;;  %v40_v5 = vld [vmem:[%s267_s1] sm:$0x3f]  ;;  %s217_s1 = smov [#allocation5]  }
   0xa   :  { %v73_v6 = vld [vmem:[%s270_s4] sm:$0x7] }
   0xb   :  { %66 = vmatpush.msra.mxu0 %v37_v4  ;;  %v72_v10 = vld [vmem:[%s269_s3] sm:$0x7]  ;;  %s134_s3 = sshll.u32 %s217_s1, 4  ;;  %s135_s3 = int_to_ptr.vmem [resolvable:$true] %s134_s3 }
   0xc   :  { %146 = vmatmul.msk.f32.vlgmr.msra.gmra.mxu0 %vm47_vm0, %v40_v5 }
  0x10   :  { %76 = vperm.xlu0 %154, %v73_v6  }
  0x7a   :  { %v45_v7 = vpop.permute.xlu0 %44 }
  0x82   :  { %v77_v12 = vpop.permute.xlu0 %76 }
  0x89   :  { %v68_v8 = vpop.f32.mrf.mxu0 }
  0x8a   :  { %v69_v9 = vadd.f32 %v68_v8, %v45_v7 }
  0x8c   :  { %155 = vtanh.f32 %v69_v9 }
  0x92   :  { %v156_v11 = vpop.eup %155 }
  0x93   :  { %147 = vmatpush.msk.msra.mxu1 %vm83_vm1, %v156_v11 }
  0x94   :  { %148 = vmatmul.msk.f32.vlgmr.msra.gmra.mxu1 %vm79_vm2, %v72_v10 }
 0x111   :  { %v104_v13 = vpop.f32.mrf.mxu1 }
 0x112   :  { %v105_v14 = vadd.f32 %v104_v13, %v77_v12 }
 0x114   :  { %v108_v15 = vsel %vm107_vm3, %v105_v14, -inf }
 0x115   :  { %v109_v16 = vrot.slane %v108_v15, 4 }
 0x117   :  { %v110_v17 = vmax.f32 %v108_v15, %v109_v16 }
 0x119   :  { %v111_v18 = vrot.slane %v110_v17, 2 }
 0x11b   :  { %v112_v19 = vmax.f32 %v110_v17, %v111_v18 }
 0x11d   :  { %v113_v20 = vrot.slane %v112_v19, 1 }
 0x11f   :  { %v114_v21 = vmax.f32 %v112_v19, %v113_v20 }
 0x121   :  { %v115_v22 = vsub.f32 %v105_v14, %v114_v21 }
 0x123   :  { %v116_v23 = vmul.f32 1.442695, %v115_v22 }
 0x125   :  { %157 = vpow2.f32 %v116_v23 }
 0x12b   :  { %v158_v24 = vpop.eup %157 }
 0x12c   :  { %v118_v25 = vsel %vm107_vm3, %v158_v24, 0.0 }
 0x12d   :  { %v119_v26 = vrot.slane %v118_v25, 4 }
 0x12f   :  { %v120_v27 = vadd.f32 %v119_v26, %v118_v25 }
 0x131   :  { %v121_v28 = vrot.slane %v120_v27, 2 }
 0x133   :  { %v122_v29 = vadd.f32 %v121_v28, %v120_v27 }
 0x135   :  { %v123_v30 = vrot.slane %v122_v29, 1 }
 0x137   :  { %v124_v31 = vadd.f32 %v123_v30, %v122_v29 }
 0x139   :  { %159 = vlog2.f32 %v124_v31 }
 0x13f   :  { %v160_v32 = vpop.eup %159 }
 0x140   :  { %v126_v33 = vmul.f32 0.6931472, %v160_v32 }
 0x142   :  { %v127_v34 = vsub.f32 %v115_v22, %v126_v33 }
 0x144   :  { %128 = vst [vmem:[#allocation5] sm:$0x7] %v127_v34 }
 0x145   :  { %139 = dma.vmem_to_hbm [thread:$0]  %s135_s3, 64, %s137_s7, [#allocation4]  }
 0x146   :  { %211 = dma.done.wait [#allocation4], 64  }
 0x147   :  { %212 = vsyncadd [#allocation4], 4294967232 }
 0x148   :  { %144 = vsyncpa [#allocation3], 1 }
 0x149   :  { %145 = vsyncpa [#allocation4], 1 }

</bundles_post_ra>
